<compile_context>
chip_gen: v5e
topology: v5e:2x2
jax: 0.10.0
libtpu: 0.0.40
codegen_flags: <defaults>
</compile_context>

<pallas_src>
import math

import jax
import jax.numpy as jnp
from jax.experimental import pallas as pl
from jax.experimental.pallas import tpu as pltpu

# Set to jnp.bfloat16 on v6e/v7x for higher MXU throughput on the hidden
# matmuls (accumulation stays f32 via preferred_element_type). Kept f32 here
# so the correctness check against the f32 reference holds at 1e-5.
MATMUL_DTYPE = jnp.float32


def _round_up(x, m):
    return ((x + m - 1) // m) * m


def _make_mlp_kernel(layer_dims, matmul_dtype):
    """Kernel ref order: x_ref, (w0, b0, ..., w_{L-1}, b_{L-1}), out_ref.

    Activations are feature-major: (features, TILE_B), batch on lanes.
    Weights are (d_out, d_in) except layers with d_out==1 and d_in>1, which
    the wrapper pre-transposes to (d_in, 1) so they run as VPU-mul + sublane
    reduce. Biases are (d_out, 1).
    """
    num_layers = len(layer_dims) - 1

    def kernel(*refs):
        x_ref = refs[0]
        out_ref = refs[-1]
        param_refs = refs[1:-1]

        h = x_ref[...].astype(jnp.float32)  # (d0, TILE_B)
        for i in range(num_layers):
            d_in, d_out = layer_dims[i], layer_dims[i + 1]
            w = param_refs[2 * i][...].astype(jnp.float32)
            b = param_refs[2 * i + 1][...].astype(jnp.float32)  # (d_out, 1)

            if d_in == 1:
                # K=1 "matmul" is an outer product -> pure VPU broadcast-mul.
                y = w * h + b                                   # (d_out, TILE_B)
            elif d_out == 1:
                # Output-dim-1 layer: VPU multiply + XLU sublane reduce.
                # w was passed transposed as (d_in, 1).
                y = jnp.sum(w * h, axis=0, keepdims=True) + b   # (1, TILE_B)
            else:
                # Real hidden matmul on the MXU; N = TILE_B keeps lanes dense.
                y = jnp.dot(
                    w.astype(matmul_dtype),
                    h.astype(matmul_dtype),
                    preferred_element_type=jnp.float32,
                ) + b                                           # (d_out, TILE_B)

            h = jnp.tanh(y)   # EUP: separate bundle slot, effectively free here
        out_ref[...] = h.astype(out_ref.dtype)

    return kernel


def visual_comfort_forward(x, params, *, tile_b=1024, matmul_dtype=MATMUL_DTYPE):
    """Forward pass of VisualComfortModel as a single gridded Pallas kernel.

    Args:
      x: (batch, in_features) array.
      params: list of (w, b) with PyTorch layout w: (d_out, d_in), b: (d_out,).
      tile_b: max batch-tile width (rounded to a multiple of 128).

    Returns:
      (batch, out_features) float32 array = tanh applied after every linear.
    """
    x = jnp.asarray(x, jnp.float32)
    B, in_features = x.shape
    layer_dims = [in_features] + [int(w.shape[0]) for w, _ in params]
    out_features = layer_dims[-1]

    # Feature-major layout: batch on the lane (last/128) axis. For the
    # (B, 1)-shaped brightness input this transpose is just a reshape.
    x_t = x.T  # (in_features, B)

    # Batch tile: multiple of 128, no larger than needed, capped by tile_b.
    tile_b = max(128, min(_round_up(int(tile_b), 128), _round_up(B, 128)))
    b_pad = _round_up(B, tile_b)
    if b_pad != B:
        x_t = jnp.pad(x_t, ((0, 0), (0, b_pad - B)))

    # Parameters in kernel layout.
    flat_params = []
    for (w, b), d_in, d_out in zip(params, layer_dims[:-1], layer_dims[1:]):
        w = jnp.asarray(w, jnp.float32)
        b = jnp.asarray(b, jnp.float32).reshape(d_out, 1)
        if d_out == 1 and d_in > 1:
            w = w.T  # (d_in, 1): enables the VPU-mul + sublane-reduce path
        flat_params += [w, b]

    kernel = _make_mlp_kernel(tuple(layer_dims), matmul_dtype)
    num_steps = b_pad // tile_b

    in_specs = [pl.BlockSpec((in_features, tile_b), lambda i: (0, i))]
    for p in flat_params:
        # Constant index_map -> parameters stay resident in VMEM across steps.
        in_specs.append(pl.BlockSpec(p.shape, lambda i: (0, 0)))
    out_spec = pl.BlockSpec((out_features, tile_b), lambda i: (0, i))

    flops = 2 * b_pad * sum(a * c for a, c in zip(layer_dims[:-1], layer_dims[1:]))
    transcendentals = b_pad * sum(layer_dims[1:])
    bytes_accessed = 4 * (
        b_pad * (in_features + out_features) + sum(int(p.size) for p in flat_params)
    )

    out_t = pl.pallas_call(
        kernel,
        out_shape=jax.ShapeDtypeStruct((out_features, b_pad), jnp.float32),
        grid=(num_steps,),
        in_specs=in_specs,
        out_specs=out_spec,
        compiler_params=pltpu.CompilerParams(
            dimension_semantics=("parallel",),      # 2-TC sharding on v7x
            vmem_limit_bytes=32 * 1024 * 1024,      # safe on v5e/v6e/v7x
        ),
        cost_estimate=pl.CostEstimate(
            flops=flops,
            transcendentals=transcendentals,
            bytes_accessed=bytes_accessed,
        ),
    )(x_t, *flat_params)

    # Back to batch-major; drop batch padding.
    return out_t.T[:B]


def init_params(key, in_features, hidden_sizes, out_features):
    """Deterministic init, PyTorch nn.Linear layout/scale: w (d_out, d_in), b (d_out,)."""
    layer_dims = [in_features] + list(hidden_sizes) + [out_features]
    params = []
    for i in range(len(layer_dims) - 1):
        d_in, d_out = layer_dims[i], layer_dims[i + 1]
        key, kw, kb = jax.random.split(key, 3)
        bound = 1.0 / math.sqrt(d_in)
        w = jax.random.uniform(kw, (d_out, d_in), jnp.float32, -bound, bound)
        b = jax.random.uniform(kb, (d_out,), jnp.float32, -bound, bound)
        params.append((w, b))
    return params


def reference_forward(x, params):
    """Plain-JAX reference matching the PyTorch forward (tanh after every linear)."""
    h = x
    for w, b in params:
        h = jnp.tanh(h @ w.T + b)
    return h


if __name__ == "__main__":
    # Module configuration consistent with the PyTorch model: brightness input
    # is (num_data, 1), hidden MLP, single visual-sensation vote in [-1, 1].
    in_features = 1
    hidden_sizes = [32, 32]
    out_features = 1

    key = jax.random.PRNGKey(0)
    key, kx, kx2 = jax.random.split(key, 3)
    params = init_params(key, in_features, hidden_sizes, out_features)

    # Small batch (pads to one 128-lane tile, grid of 1 step).
    x = jax.random.uniform(kx, (8, in_features), jnp.float32, 0.0, 1.0)
    out = jax.block_until_ready(visual_comfort_forward(x, params))
    ref = reference_forward(x, params)
    assert out.shape == (8, out_features)
    assert jnp.allclose(out, ref, atol=1e-5, rtol=1e-5), "mismatch vs reference (batch=8)"

    # Larger batch forcing a multi-step batch grid (3 tiles of 128) + padding.
    x2 = jax.random.uniform(kx2, (300, in_features), jnp.float32, 0.0, 1.0)
    out2 = jax.block_until_ready(visual_comfort_forward(x2, params, tile_b=128))
    ref2 = reference_forward(x2, params)
    assert out2.shape == (300, out_features)
    assert jnp.allclose(out2, ref2, atol=1e-5, rtol=1e-5), "mismatch vs reference (batch=300)"

    print("KERNEL_OK")
</pallas_src>

<mosaic_0001>
module attributes {stable_mosaic.version = 11 : i64} {
  func.func @kernel(%arg0: i32, %arg1: memref<1x128xf32, #tpu.memory_space<vmem>>, %arg2: memref<32x1xf32, #tpu.memory_space<vmem>>, %arg3: memref<32x1xf32, #tpu.memory_space<vmem>>, %arg4: memref<32x32xf32, #tpu.memory_space<vmem>>, %arg5: memref<32x1xf32, #tpu.memory_space<vmem>>, %arg6: memref<32x1xf32, #tpu.memory_space<vmem>>, %arg7: memref<1x1xf32, #tpu.memory_space<vmem>>, %arg8: memref<1x128xf32, #tpu.memory_space<vmem>>) attributes {dimension_semantics = [#tpu.dimension_semantics<parallel>], iteration_bounds = array<i64: 1>, scalar_prefetch = 0 : i64, scratch_operands = 0 : i64, tpu.core_type = #tpu.core_type<tc>, window_params = [{transform_indices = @transform_0, window_bounds = array<i64: 1, 128>}, {pipeline_mode = #tpu.pipeline_mode<synchronous>, transform_indices = @transform_1, window_bounds = array<i64: 32, 1>}, {pipeline_mode = #tpu.pipeline_mode<synchronous>, transform_indices = @transform_2, window_bounds = array<i64: 32, 1>}, {pipeline_mode = #tpu.pipeline_mode<synchronous>, transform_indices = @transform_3, window_bounds = array<i64: 32, 32>}, {pipeline_mode = #tpu.pipeline_mode<synchronous>, transform_indices = @transform_4, window_bounds = array<i64: 32, 1>}, {pipeline_mode = #tpu.pipeline_mode<synchronous>, transform_indices = @transform_5, window_bounds = array<i64: 32, 1>}, {pipeline_mode = #tpu.pipeline_mode<synchronous>, transform_indices = @transform_6, window_bounds = array<i64: 1, 1>}, {transform_indices = @transform_7, window_bounds = array<i64: 1, 128>}]} {
    %c0 = arith.constant 0 : index
    %c0_0 = arith.constant 0 : index
    %0 = vector.load %arg1[%c0, %c0_0] : memref<1x128xf32, #tpu.memory_space<vmem>>, vector<1x128xf32>
    %c0_1 = arith.constant 0 : index
    %c0_2 = arith.constant 0 : index
    %1 = vector.load %arg2[%c0_1, %c0_2] : memref<32x1xf32, #tpu.memory_space<vmem>>, vector<32x1xf32>
    %c0_3 = arith.constant 0 : index
    %c0_4 = arith.constant 0 : index
    %2 = vector.load %arg3[%c0_3, %c0_4] : memref<32x1xf32, #tpu.memory_space<vmem>>, vector<32x1xf32>
    %3 = vector.broadcast %1 : vector<32x1xf32> to vector<32x128xf32>
    %4 = vector.broadcast %0 : vector<1x128xf32> to vector<32x128xf32>
    %5 = arith.mulf %3, %4 : vector<32x128xf32>
    %6 = vector.broadcast %2 : vector<32x1xf32> to vector<32x128xf32>
    %7 = arith.addf %5, %6 : vector<32x128xf32>
    %8 = math.tanh %7 : vector<32x128xf32>
    %c0_5 = arith.constant 0 : index
    %c0_6 = arith.constant 0 : index
    %9 = vector.load %arg4[%c0_5, %c0_6] : memref<32x32xf32, #tpu.memory_space<vmem>>, vector<32x32xf32>
    %c0_7 = arith.constant 0 : index
    %c0_8 = arith.constant 0 : index
    %10 = vector.load %arg5[%c0_7, %c0_8] : memref<32x1xf32, #tpu.memory_space<vmem>>, vector<32x1xf32>
    %cst = arith.constant dense<0.000000e+00> : vector<32x128xf32>
    %11 = tpu.matmul %9, %8, %cst {dimension_numbers = #tpu.dot_dimension_numbers<[1], [0], [0], [1], [0, 0, 1, 1], [], []>} : vector<32x32xf32>, vector<32x128xf32>, vector<32x128xf32> -> vector<32x128xf32>
    %12 = vector.broadcast %10 : vector<32x1xf32> to vector<32x128xf32>
    %13 = arith.addf %11, %12 : vector<32x128xf32>
    %14 = math.tanh %13 : vector<32x128xf32>
    %c0_9 = arith.constant 0 : index
    %c0_10 = arith.constant 0 : index
    %15 = vector.load %arg6[%c0_9, %c0_10] : memref<32x1xf32, #tpu.memory_space<vmem>>, vector<32x1xf32>
    %c0_11 = arith.constant 0 : index
    %c0_12 = arith.constant 0 : index
    %16 = vector.load %arg7[%c0_11, %c0_12] : memref<1x1xf32, #tpu.memory_space<vmem>>, vector<1x1xf32>
    %17 = vector.broadcast %15 : vector<32x1xf32> to vector<32x128xf32>
    %18 = arith.mulf %17, %14 : vector<32x128xf32>
    %cst_13 = arith.constant dense<0.000000e+00> : vector<128xf32>
    %19 = vector.multi_reduction <add>, %18, %cst_13 [0] : vector<32x128xf32> to vector<128xf32>
    %20 = vector.shape_cast %19 : vector<128xf32> to vector<1x128xf32>
    %21 = vector.broadcast %16 : vector<1x1xf32> to vector<1x128xf32>
    %22 = arith.addf %20, %21 : vector<1x128xf32>
    %23 = math.tanh %22 : vector<1x128xf32>
    %c0_14 = arith.constant 0 : index
    %c0_15 = arith.constant 0 : index
    %24 = vector.load %arg8[%c0_14, %c0_15] : memref<1x128xf32, #tpu.memory_space<vmem>>, vector<1x128xf32>
    tpu.vector_store %arg8[%c0_14, %c0_15], %23 {strides = array<i32>} : memref<1x128xf32, #tpu.memory_space<vmem>>, vector<1x128xf32>,
    return
  }
  func.func @transform_0(%arg0: i32) -> (i32, i32) {
    %c0_i32 = arith.constant 0 : i32
    %c0_i32_0 = arith.constant 0 : i32
    return %c0_i32, %arg0 : i32, i32
  }
  func.func @transform_1(%arg0: i32) -> (i32, i32) {
    %c0_i32 = arith.constant 0 : i32
    %c0_i32_0 = arith.constant 0 : i32
    %c0_i32_1 = arith.constant 0 : i32
    return %c0_i32, %c0_i32_0 : i32, i32
  }
  func.func @transform_2(%arg0: i32) -> (i32, i32) {
    %c0_i32 = arith.constant 0 : i32
    %c0_i32_0 = arith.constant 0 : i32
    %c0_i32_1 = arith.constant 0 : i32
    return %c0_i32, %c0_i32_0 : i32, i32
  }
  func.func @transform_3(%arg0: i32) -> (i32, i32) {
    %c0_i32 = arith.constant 0 : i32
    %c0_i32_0 = arith.constant 0 : i32
    %c0_i32_1 = arith.constant 0 : i32
    return %c0_i32, %c0_i32_0 : i32, i32
  }
  func.func @transform_4(%arg0: i32) -> (i32, i32) {
    %c0_i32 = arith.constant 0 : i32
    %c0_i32_0 = arith.constant 0 : i32
    %c0_i32_1 = arith.constant 0 : i32
    return %c0_i32, %c0_i32_0 : i32, i32
  }
  func.func @transform_5(%arg0: i32) -> (i32, i32) {
    %c0_i32 = arith.constant 0 : i32
    %c0_i32_0 = arith.constant 0 : i32
    %c0_i32_1 = arith.constant 0 : i32
    return %c0_i32, %c0_i32_0 : i32, i32
  }
  func.func @transform_6(%arg0: i32) -> (i32, i32) {
    %c0_i32 = arith.constant 0 : i32
    %c0_i32_0 = arith.constant 0 : i32
    %c0_i32_1 = arith.constant 0 : i32
    return %c0_i32, %c0_i32_0 : i32, i32
  }
  func.func @transform_7(%arg0: i32) -> (i32, i32) {
    %c0_i32 = arith.constant 0 : i32
    %c0_i32_0 = arith.constant 0 : i32
    return %c0_i32, %arg0 : i32, i32
  }
}

</mosaic_0001>

<bundles_post_ra>
// kernel: tpu_custom_call.1
= control target key start
LH: loop header
LB: loop body
LE: loop exit
PB: predicated region body
PF: predicated region fallthrough
CT: control target
= control target key end

     0   :  { %s407_s0 = inlined_call_operand.vmem [shape: f32[1,128], index: 0, kind: input, shape index: {}]   ;;  %s408_s1 = inlined_call_operand.vmem [shape: f32[32,1], index: 1, kind: input, shape index: {}]   ;;  %s409_s2 = inlined_call_operand.vmem [shape: f32[32,1], index: 2, kind: input, shape index: {}]   ;;  %s410_s3 = inlined_call_operand.vmem [shape: f32[32,32], index: 3, kind: input, shape index: {}]   ;;  %s411_s4 = inlined_call_operand.vmem [shape: f32[32,1], index: 4, kind: input, shape index: {}]   ;;  %s412_s5 = inlined_call_operand.vmem [shape: f32[32,1], index: 5, kind: input, shape index: {}]   ;;  %s413_s6 = inlined_call_operand.<no memory space> [shape: f32[1,1], index: 6, kind: input, shape index: {}]   ;;  %s414_s7 = inlined_call_operand.hbm [shape: f32[1,128], index: 7, kind: output, shape index: {}]  }
   0x1   :  { %v12_v0 = vstv %s413_s6 }
   0x2   :  { %13 = vst [vmem:[#allocation2] sm:$0x1] %v12_v0 }
   0x3   :  { %v37_v1 = vld [vmem:[%s409_s2 + $0x18] sm:$0xff]  ;;  %v36_v2 = vld [vmem:[%s409_s2 + $0x10] sm:$0xff]  ;;  %v296_v4 = vmov 0  }
   0x4   :  { %v33_v3 = vld [vmem:[%s408_s1 + $0x18] sm:$0xff]  ;;  %250 = vset.pattern.permute.xlu2 %v296_v4  ;;  %249 = vset.pattern.permute.xlu1 %v296_v4 }
   0x5   :  { %248 = vset.pattern.permute.xlu0 %v296_v4  ;;  %82 = vperm.xlu1 %249, %v37_v1  }
   0x6   :  { %77 = vperm.xlu2 %250, %v36_v2   ;;  %55 = vperm.xlu0 %248, %v33_v3  }
   0x7   :  { %14 = vsyncpa [#allocation4], 0  ;;  %v31_v5 = vld [vmem:[%s408_s1 + $0x8] sm:$0xff]  ;;  %v32_v6 = vld [vmem:[%s408_s1 + $0x10] sm:$0xff]  ;;  %vm121_vm0 = vcmask 261120   ;;  %s221_s18 = sshll.u32 %s414_s7, 4  ;;  %s222_s18 = int_to_ptr.hbm [resolvable:$true] %s221_s18 }
   0x8   :  { %v30_v7 = vld [vmem:[%s408_s1] sm:$0xff]  ;;  %v35_v9 = vld [vmem:[%s409_s2 + $0x8] sm:$0xff]  ;;  %v99_v11 = vld [vmem:[%s411_s4 + $0x10] sm:$0xff] }
   0x9   :  { %v34_v8 = vld [vmem:[%s409_s2] sm:$0xff]  ;;  %v98_v12 = vld [vmem:[%s411_s4 + $0x8] sm:$0xff]  ;;  %v100_v13 = vld [vmem:[%s411_s4 + $0x18] sm:$0xff] }
   0xa   :  { %v97_v10 = vld [vmem:[%s411_s4] sm:$0xff]  ;;  %v168_v14 = vld [vmem:[%s412_s5 + $0x8] sm:$0xff]  ;;  %v169_v16 = vld [vmem:[%s412_s5 + $0x10] sm:$0xff] }
   0xb   :  { %v167_v15 = vld [vmem:[%s412_s5] sm:$0xff]  ;;  %v170_v18 = vld [vmem:[%s412_s5 + $0x18] sm:$0xff]  ;;  %v94_v41 = vld [vmem:[%s410_s3 + $0x8] sm:$0xff] }
   0xc   :  { %v171_v17 = vld [vmem:[#allocation2] sm:$0x1]  ;;  %v95_v42 = vld [vmem:[%s410_s3 + $0x10] sm:$0xff]  ;;  %v96_v43 = vld [vmem:[%s410_s3 + $0x18] sm:$0xff] }
   0xd   :  { %45 = vperm.xlu1 %249, %v31_v5   ;;  %v251_v19 = vld [vmem:[%s407_s0] ss:$0 sm:$0xff] }
   0xe   :  { %50 = vperm.xlu0 %248, %v32_v6   ;;  %40 = vperm.xlu2 %250, %v30_v7   ;;  %v93_v40 = vld [vmem:[%s410_s3] sm:$0xff]  ;;  %s297_s3 = smov [#allocation3]  }
   0xf   :  { %s219_s15 = sshll.u32 %s297_s3, 4  ;;  %s220_s15 = int_to_ptr.vmem [resolvable:$true] %s219_s15 }
  0x15   :  { %67 = vperm.xlu1 %249, %v34_v8  }
  0x16   :  { %72 = vperm.xlu0 %248, %v35_v9   ;;  %103 = vperm.xlu2 %250, %v97_v10  }
  0x1d   :  { %113 = vperm.xlu1 %249, %v99_v11  }
  0x1e   :  { %108 = vperm.xlu0 %248, %v98_v12   ;;  %118 = vperm.xlu2 %250, %v100_v13  }
  0x25   :  { %179 = vperm.xlu1 %249, %v168_v14  }
  0x26   :  { %174 = vperm.xlu0 %248, %v167_v15   ;;  %184 = vperm.xlu2 %250, %v169_v16  }
  0x2d   :  { %207 = vperm.xlu1 %249, %v171_v17  }
  0x2e   :  { %189 = vperm.xlu0 %248, %v170_v18  }
  0x60   :  { %v78_v24 = vpop.permute.xlu2 %77 }
  0x68   :  { %v41_v30 = vpop.permute.xlu2 %40 }
  0x69   :  { %v61_v31 = vmul.f32 %v251_v19, %v41_v30 }
  0x70   :  { %v104_v44 = vpop.permute.xlu2 %103 }
  0x77   :  { %v83_v20 = vpop.permute.xlu1 %82 }
  0x78   :  { %v56_v21 = vpop.permute.xlu0 %55  ;;  %v119_v51 = vpop.permute.xlu2 %118 }
  0x79   :  { %v64_v22 = vmul.f32 %v251_v19, %v56_v21 }
  0x7b   :  { %v88_v23 = vadd.f32 %v83_v20, %v64_v22 }
  0x7d   :  { %252 = vtanh.f32 %v88_v23 }
  0x7f   :  { %v46_v25 = vpop.permute.xlu1 %45 }
  0x80   :  { %v51_v26 = vpop.permute.xlu0 %50  ;;  %v62_v32 = vmul.f32 %v251_v19, %v46_v25  ;;  %v185_v63 = vpop.permute.xlu2 %184 }
  0x81   :  { %v63_v27 = vmul.f32 %v251_v19, %v51_v26 }
  0x83   :  { %v253_v28 = vpop.eup %252  ;;  %v87_v29 = vadd.f32 %v78_v24, %v63_v27 }
  0x84   :  { %146 = vmatpush.msra.mxu0 %v253_v28  ;;  %234 = vmatpush.msra.mxu1 %v253_v28 }
  0x85   :  { %254 = vtanh.f32 %v87_v29  ;;  %235 = vmatpush.msra.mxu2 %v253_v28  ;;  %236 = vmatpush.msra.mxu3 %v253_v28 }
  0x87   :  { %v68_v33 = vpop.permute.xlu1 %67 }
  0x88   :  { %v73_v34 = vpop.permute.xlu0 %72  ;;  %v85_v36 = vadd.f32 %v68_v33, %v61_v31 }
  0x89   :  { %v86_v35 = vadd.f32 %v73_v34, %v62_v32 }
  0x8b   :  { %v255_v37 = vpop.eup %254  ;;  %256 = vtanh.f32 %v86_v35 }
  0x8c   :  { %147 = vmatpush.msra.mxu0 %v255_v37  ;;  %237 = vmatpush.msra.mxu1 %v255_v37  ;;  %258 = vtanh.f32 %v85_v36 }
  0x8d   :  { %238 = vmatpush.msra.mxu2 %v255_v37  ;;  %239 = vmatpush.msra.mxu3 %v255_v37 }
  0x8f   :  { %v114_v50 = vpop.permute.xlu1 %113 }
  0x90   :  { %v109_v45 = vpop.permute.xlu0 %108 }
  0x91   :  { %v257_v38 = vpop.eup %256 }
  0x92   :  { %148 = vmatpush.msra.mxu0 %v257_v38  ;;  %240 = vmatpush.msra.mxu1 %v257_v38  ;;  %v259_v39 = vpop.eup %258 }
  0x93   :  { %241 = vmatpush.msra.mxu2 %v257_v38  ;;  %242 = vmatpush.msra.mxu3 %v257_v38 }
  0x94   :  { %149 = vmatpush.msra.mxu0 %v259_v39  ;;  %243 = vmatpush.msra.mxu1 %v259_v39 }
  0x95   :  { %244 = vmatpush.msra.mxu2 %v259_v39  ;;  %245 = vmatpush.msra.mxu3 %v259_v39 }
  0x96   :  { %230 = vmatmul.msk.f32.vlgmr.msra.gmra.mxu0 %vm121_vm0, %v93_v40  ;;  %231 = vmatmul.msk.f32.vlgmr.msra.gmra.mxu1 %vm121_vm0, %v94_v41 }
  0x97   :  { %232 = vmatmul.msk.f32.vlgmr.msra.gmra.mxu2 %vm121_vm0, %v95_v42  ;;  %233 = vmatmul.msk.f32.vlgmr.msra.gmra.mxu3 %vm121_vm0, %v96_v43  ;;  %v180_v59 = vpop.permute.xlu1 %179 }
  0x98   :  { %v175_v54 = vpop.permute.xlu0 %174 }
  0x9f   :  { %v208_v11 = vpop.permute.xlu1 %207 }
  0xa0   :  { %v190_v3 = vpop.permute.xlu0 %189  ;;  %v210_v13 = vperm.slane %v208_v11, 0 }
 0x113   :  { %v151_v46 = vpop.f32.mrf.mxu0  ;;  %v154_v47 = vpop.f32.mrf.mxu1 }
 0x114   :  { %v152_v48 = vadd.f32 %v151_v46, %v104_v44  ;;  %v155_v49 = vadd.f32 %v154_v47, %v109_v45 }
 0x116   :  { %260 = vtanh.f32 %v152_v48 }
 0x117   :  { %262 = vtanh.f32 %v155_v49 }
 0x11a   :  { %v157_v52 = vpop.f32.mrf.mxu2  ;;  %v160_v53 = vpop.f32.mrf.mxu3 }
 0x11b   :  { %v158_v55 = vadd.f32 %v157_v52, %v114_v50  ;;  %v161_v56 = vadd.f32 %v160_v53, %v119_v51 }
 0x11c   :  { %v261_v57 = vpop.eup %260 }
 0x11d   :  { %v263_v58 = vpop.eup %262  ;;  %264 = vtanh.f32 %v158_v55  ;;  %v192_v60 = vmul.f32 %v261_v57, %v175_v54 }
 0x11e   :  { %266 = vtanh.f32 %v161_v56  ;;  %v193_v61 = vmul.f32 %v263_v58, %v180_v59 }
 0x120   :  { %v196_v1 = vadd.f32 %v193_v61, %v192_v60 }
 0x123   :  { %v265_v62 = vpop.eup %264 }
 0x124   :  { %v267_v0 = vpop.eup %266  ;;  %v194_v2 = vmul.f32 %v265_v62, %v185_v63 }
 0x125   :  { %v195_v5 = vmul.f32 %v267_v0, %v190_v3 }
 0x126   :  { %v197_v4 = vadd.f32 %v196_v1, %v194_v2 }
 0x128   :  { %v198_v6 = vadd.f32 %v197_v4, %v195_v5 }
 0x12a   :  { %v199_v7 = vrot.slane %v198_v6, 4 }
 0x12c   :  { %v200_v8 = vadd.f32 %v199_v7, %v198_v6 }
 0x12e   :  { %v201_v9 = vrot.slane %v200_v8, 2 }
 0x130   :  { %v202_v10 = vadd.f32 %v201_v9, %v200_v8 }
 0x132   :  { %v203_v12 = vrot.slane %v202_v10, 1 }
 0x134   :  { %v204_v14 = vadd.f32 %v203_v12, %v202_v10 }
 0x136   :  { %v211_v15 = vadd.f32 %v210_v13, %v204_v14 }
 0x138   :  { %268 = vtanh.f32 %v211_v15 }
 0x13e   :  { %v269_v16 = vpop.eup %268 }
 0x13f   :  { %213 = vst [vmem:[#allocation3] sm:$0x1] %v269_v16 }
 0x140   :  { %224 = dma.vmem_to_hbm [thread:$0]  %s220_s15, 16, %s222_s18, [#allocation4]  }
 0x141   :  { %294 = dma.done.wait [#allocation4], 16  }
 0x142   :  { %295 = vsyncadd [#allocation4], 4294967280 }
 0x143   :  { %229 = vsyncpa [#allocation4], 1 }

</bundles_post_ra>
